<compile_context>
chip_gen: v6e
topology: v6e:2x2x1
jax: 0.10.0
libtpu: 0.0.40
codegen_flags: <defaults>
</compile_context>

<pallas_src>
import functools

import jax
import jax.numpy as jnp
import numpy as np
from jax.experimental import pallas as pl
from jax.experimental.pallas import tpu as pltpu


# ---------------------------------------------------------------------------
# Kernel: per (sample, row-tile) grid step.  Mask rebuilt from SMEM scalars as
# two 1-D band predicates (modulo arithmetic), combined at the select.
# ---------------------------------------------------------------------------
def _gridmask_kernel(params_ref, x_ref, o_ref, *, tile_h, w, off_h, off_w, mode):
    b = pl.program_id(0)          # sample index
    t = pl.program_id(1)          # row-tile index

    apply_b = params_ref[0, b]    # 1 -> mask this sample, 0 -> pass through
    d = params_ref[1, b]          # grid period
    l = params_ref[2, b]          # band width
    st_h = params_ref[3, b]       # band start offset (rows, extended grid)
    st_w = params_ref[4, b]       # band start offset (cols, extended grid)
    nb_h = params_ref[5, b]       # number of row bands  (hh // d)
    nb_w = params_ref[6, b]       # number of col bands  (ww // d)

    @pl.when(apply_b == 0)
    def _passthrough():
        o_ref[...] = x_ref[...]

    @pl.when(apply_b != 0)
    def _masked():
        d_f = d.astype(jnp.float32)
        l_f = l.astype(jnp.float32)

        # Indices in the extended (1.5*h, 1.5*w) mask grid, kept separable:
        # rows as (tile_h, 1), cols as (1, w).
        row_idx = (jax.lax.broadcasted_iota(jnp.int32, (tile_h, 1), 0)
                   + (t * tile_h + off_h))
        col_idx = jax.lax.broadcasted_iota(jnp.int32, (1, w), 1) + off_w

        def band_pred(rel, nb):
            # exists i in [0, nb): i*d <= rel < i*d + l
            #   <=>  rel >= 0  and  rel mod d < l  and  rel < nb*d
            # Float quotient is exact here: rel <= 1.5*max(H,W) and d in
            # [d1, d2) are exactly representable, and the quotient's distance
            # to an integer (>= 1/d) dwarfs f32 rounding for realistic sizes.
            rel_f = rel.astype(jnp.float32)
            q = jnp.floor(rel_f / d_f)
            rem = rel_f - q * d_f
            return (rel >= 0) & (rem < l_f) & (rel < nb * d)

        row_in = band_pred(row_idx - st_h, nb_h)   # (tile_h, 1) bool
        col_in = band_pred(col_idx - st_w, nb_w)   # (1, w) bool
        in_band = row_in | col_in                  # broadcast -> (tile_h, w)

        # Original: mask = 1 outside bands, 0 inside; mode==1 inverts it.
        keep = in_band if mode == 1 else jnp.logical_not(in_band)

        zero = jnp.zeros((), dtype=o_ref.dtype)
        o_ref[...] = jnp.where(keep[None, None, :, :], x_ref[...], zero)


def _choose_tile_h(h, c, w, itemsize, budget_bytes=8 << 20):
    """Largest multiple-of-8 divisor of h whose (in+out, double-buffered)
    per-step footprint stays under budget; full h if it already fits."""
    per_row = 4 * c * w * itemsize            # 2 bufs x (in + out)
    max_rows = max(1, budget_bytes // per_row)
    if max_rows >= h:
        return h
    best = None
    t = 8
    while t <= min(h, max_rows):
        if h % t == 0:
            best = t
        t += 8
    return best if best is not None else h


def gridmask_apply(x, params, *, mode=1, tile_h=None):
    n, c, h, w = x.shape
    hh, ww = int(1.5 * h), int(1.5 * w)
    off_h, off_w = (hh - h) // 2, (ww - w) // 2
    if tile_h is None:
        tile_h = _choose_tile_h(h, c, w, x.dtype.itemsize)
    assert h % tile_h == 0

    kernel = functools.partial(
        _gridmask_kernel, tile_h=tile_h, w=w,
        off_h=off_h, off_w=off_w, mode=mode)

    nbytes = n * c * h * w * x.dtype.itemsize
    return pl.pallas_call(
        kernel,
        out_shape=jax.ShapeDtypeStruct((n, c, h, w), x.dtype),
        grid_spec=pltpu.PrefetchScalarGridSpec(
            num_scalar_prefetch=1,
            grid=(n, h // tile_h),
            in_specs=[pl.BlockSpec((1, c, tile_h, w),
                                   lambda b, t, p: (b, 0, t, 0))],
            out_specs=pl.BlockSpec((1, c, tile_h, w),
                                   lambda b, t, p: (b, 0, t, 0)),
        ),
        compiler_params=pltpu.CompilerParams(
            dimension_semantics=("parallel", "parallel")),
        cost_estimate=pl.CostEstimate(flops=n * c * h * w,
                                      transcendentals=0,
                                      bytes_accessed=2 * nbytes),
    )(params, x)


# ---------------------------------------------------------------------------
# Host-side random parameter generation (mirrors Grid.__call__ randomness).
# Returned layout: (7, N) int32 -> [apply, d, l, st_h, st_w, nb_h, nb_w].
# ---------------------------------------------------------------------------
def make_gridmask_params(key, n, h, w, *, prob=0.7, ratio=0.5, d1=5, d2=15):
    kp, kd, kh, kw = jax.random.split(key, 4)
    apply_f = (jax.random.uniform(kp, (n,)) <= prob).astype(jnp.int32)
    d = jax.random.randint(kd, (n,), d1, d2, dtype=jnp.int32)
    # ratio != 1 branch of Grid.__call__ (GridMask default ratio=0.5)
    l = jnp.clip(jnp.floor(d.astype(jnp.float32) * ratio + 0.5).astype(jnp.int32),
                 1, d - 1)
    st_h = jnp.floor(jax.random.uniform(kh, (n,)) * d.astype(jnp.float32)).astype(jnp.int32)
    st_w = jnp.floor(jax.random.uniform(kw, (n,)) * d.astype(jnp.float32)).astype(jnp.int32)
    hh, ww = int(1.5 * h), int(1.5 * w)
    nb_h = hh // d
    nb_w = ww // d
    return jnp.stack([apply_f, d, l, st_h, st_w, nb_h, nb_w], axis=0).astype(jnp.int32)


def grid_mask_forward(x, params, *, training=True, mode=1):
    """GridMask.forward: identity in eval mode, per-sample grid masking in train."""
    if not training:
        return x
    return gridmask_apply(x, params, mode=mode)


# ---------------------------------------------------------------------------
# Pure-numpy reference (replicates Grid.__call__ with r=0, offset=False).
# ---------------------------------------------------------------------------
def gridmask_reference(x_np, params_np, mode=1):
    n, c, h, w = x_np.shape
    hh, ww = int(1.5 * h), int(1.5 * w)
    out = x_np.copy()
    for b in range(n):
        apply_b, d, l, st_h, st_w = [int(v) for v in params_np[:5, b]]
        if apply_b == 0:
            continue
        mask = np.ones((hh, ww), np.float32)
        for i in range(hh // d):
            s = d * i + st_h
            t = min(s + l, hh)
            mask[s:t, :] = 0.0
        for i in range(ww // d):
            s = d * i + st_w
            t = min(s + l, ww)
            mask[:, s:t] = 0.0
        mask = mask[(hh - h) // 2:(hh - h) // 2 + h,
                    (ww - w) // 2:(ww - w) // 2 + w]
        if mode == 1:
            mask = 1.0 - mask
        out[b] = out[b] * mask[None, :, :]
    return out


if __name__ == "__main__":
    key = jax.random.PRNGKey(0)
    kx, kp = jax.random.split(key)

    N, C, H, W = 2, 4, 16, 16
    x = jax.random.normal(kx, (N, C, H, W), jnp.float32)

    params = make_gridmask_params(kp, N, H, W, prob=0.7, ratio=0.5)
    # Deterministic demo: exercise both the masked and the pass-through path.
    params = params.at[0, 0].set(1)
    params = params.at[0, 1].set(0)

    out = grid_mask_forward(x, params, training=True, mode=1)
    out = jax.block_until_ready(out)

    ref = gridmask_reference(np.asarray(x), np.asarray(params), mode=1)
    assert out.shape == (N, C, H, W), out.shape
    np.testing.assert_allclose(np.asarray(out), ref, rtol=1e-6, atol=1e-6)
    print("KERNEL_OK")
</pallas_src>

<mosaic_0001>
module attributes {stable_mosaic.version = 11 : i64} {
  func.func @_gridmask_kernel(%arg0: i32, %arg1: i32, %arg2: memref<7x2xi32, #tpu.memory_space<smem>>, %arg3: memref<1x4x16x16xf32, #tpu.memory_space<vmem>>, %arg4: memref<1x4x16x16xf32, #tpu.memory_space<vmem>>) attributes {dimension_semantics = [#tpu.dimension_semantics<parallel>, #tpu.dimension_semantics<parallel>], iteration_bounds = array<i64: 2, 1>, scalar_prefetch = 1 : i64, scratch_operands = 0 : i64, tpu.core_type = #tpu.core_type<tc>, window_params = [{transform_indices = @transform_0, window_bounds = array<i64: 1, 4, 16, 16>}, {transform_indices = @transform_1, window_bounds = array<i64: 1, 4, 16, 16>}]} {
    %c0 = arith.constant 0 : index
    %0 = arith.index_cast %arg0 : i32 to index
    %1 = memref.load %arg2[%c0, %0] : memref<7x2xi32, #tpu.memory_space<smem>>
    %c1 = arith.constant 1 : index
    %2 = arith.index_cast %arg0 : i32 to index
    %3 = memref.load %arg2[%c1, %2] : memref<7x2xi32, #tpu.memory_space<smem>>
    %c2 = arith.constant 2 : index
    %4 = arith.index_cast %arg0 : i32 to index
    %5 = memref.load %arg2[%c2, %4] : memref<7x2xi32, #tpu.memory_space<smem>>
    %c3 = arith.constant 3 : index
    %6 = arith.index_cast %arg0 : i32 to index
    %7 = memref.load %arg2[%c3, %6] : memref<7x2xi32, #tpu.memory_space<smem>>
    %c4 = arith.constant 4 : index
    %8 = arith.index_cast %arg0 : i32 to index
    %9 = memref.load %arg2[%c4, %8] : memref<7x2xi32, #tpu.memory_space<smem>>
    %c5 = arith.constant 5 : index
    %10 = arith.index_cast %arg0 : i32 to index
    %11 = memref.load %arg2[%c5, %10] : memref<7x2xi32, #tpu.memory_space<smem>>
    %c6 = arith.constant 6 : index
    %12 = arith.index_cast %arg0 : i32 to index
    %13 = memref.load %arg2[%c6, %12] : memref<7x2xi32, #tpu.memory_space<smem>>
    %c0_i32 = arith.constant 0 : i32
    %14 = arith.cmpi eq, %1, %c0_i32 : i32
    %15 = arith.extui %14 : i1 to i32
    %c0_i32_0 = arith.constant 0 : i32
    %16 = arith.cmpi ne, %15, %c0_i32_0 : i32
    scf.if %16 {
      %c0_3 = arith.constant 0 : index
      %c0_4 = arith.constant 0 : index
      %c0_5 = arith.constant 0 : index
      %c0_6 = arith.constant 0 : index
      %20 = vector.load %arg3[%c0_3, %c0_4, %c0_5, %c0_6] : memref<1x4x16x16xf32, #tpu.memory_space<vmem>>, vector<1x4x16x16xf32>
      %c0_7 = arith.constant 0 : index
      %c0_8 = arith.constant 0 : index
      %c0_9 = arith.constant 0 : index
      %c0_10 = arith.constant 0 : index
      %21 = vector.load %arg4[%c0_7, %c0_8, %c0_9, %c0_10] : memref<1x4x16x16xf32, #tpu.memory_space<vmem>>, vector<1x4x16x16xf32>
      tpu.vector_store %arg4[%c0_7, %c0_8, %c0_9, %c0_10], %20 {strides = array<i32>} : memref<1x4x16x16xf32, #tpu.memory_space<vmem>>, vector<1x4x16x16xf32>,
    } else {
    }
    %c0_i32_1 = arith.constant 0 : i32
    %17 = arith.cmpi ne, %1, %c0_i32_1 : i32
    %18 = arith.extui %17 : i1 to i32
    %c0_i32_2 = arith.constant 0 : i32
    %19 = arith.cmpi ne, %18, %c0_i32_2 : i32
    scf.if %19 {
      %20 = arith.sitofp %3 : i32 to f32
      %21 = arith.sitofp %5 : i32 to f32
      %22 = tpu.iota {dimensions = array<i32: 0>} : vector<16x1xi32>
      %c16_i32 = arith.constant 16 : i32
      %23 = arith.muli %arg1, %c16_i32 : i32
      %c4_i32 = arith.constant 4 : i32
      %24 = arith.addi %23, %c4_i32 : i32
      %25 = vector.broadcast %24 : i32 to vector<16x1xi32>
      %26 = arith.addi %22, %25 : vector<16x1xi32>
      %27 = tpu.iota {dimensions = array<i32: 1>} : vector<1x16xi32>
      %c4_i32_3 = arith.constant 4 : i32
      %28 = vector.broadcast %c4_i32_3 : i32 to vector<1x16xi32>
      %29 = arith.addi %27, %28 : vector<1x16xi32>
      %30 = vector.broadcast %7 : i32 to vector<16x1xi32>
      %31 = arith.subi %26, %30 : vector<16x1xi32>
      %32 = arith.sitofp %31 : vector<16x1xi32> to vector<16x1xf32>
      %33 = vector.broadcast %20 : f32 to vector<16x1xf32>
      %34 = arith.divf %32, %33 : vector<16x1xf32>
      %35 = math.floor %34 : vector<16x1xf32>
      %36 = vector.broadcast %20 : f32 to vector<16x1xf32>
      %37 = arith.mulf %35, %36 : vector<16x1xf32>
      %38 = arith.subf %32, %37 : vector<16x1xf32>
      %c0_i32_4 = arith.constant 0 : i32
      %39 = vector.broadcast %c0_i32_4 : i32 to vector<16x1xi32>
      %40 = arith.cmpi sge, %31, %39 : vector<16x1xi32>
      %41 = vector.broadcast %21 : f32 to vector<16x1xf32>
      %42 = arith.cmpf olt, %38, %41 : vector<16x1xf32>
      %43 = arith.andi %40, %42 : vector<16x1xi1>
      %44 = arith.muli %11, %3 : i32
      %45 = vector.broadcast %44 : i32 to vector<16x1xi32>
      %46 = arith.cmpi slt, %31, %45 : vector<16x1xi32>
      %47 = arith.andi %43, %46 : vector<16x1xi1>
      %48 = vector.broadcast %9 : i32 to vector<1x16xi32>
      %49 = arith.subi %29, %48 : vector<1x16xi32>
      %50 = arith.sitofp %49 : vector<1x16xi32> to vector<1x16xf32>
      %51 = vector.broadcast %20 : f32 to vector<1x16xf32>
      %52 = arith.divf %50, %51 : vector<1x16xf32>
      %53 = math.floor %52 : vector<1x16xf32>
      %54 = vector.broadcast %20 : f32 to vector<1x16xf32>
      %55 = arith.mulf %53, %54 : vector<1x16xf32>
      %56 = arith.subf %50, %55 : vector<1x16xf32>
      %c0_i32_5 = arith.constant 0 : i32
      %57 = vector.broadcast %c0_i32_5 : i32 to vector<1x16xi32>
      %58 = arith.cmpi sge, %49, %57 : vector<1x16xi32>
      %59 = vector.broadcast %21 : f32 to vector<1x16xf32>
      %60 = arith.cmpf olt, %56, %59 : vector<1x16xf32>
      %61 = arith.andi %58, %60 : vector<1x16xi1>
      %62 = arith.muli %13, %3 : i32
      %63 = vector.broadcast %62 : i32 to vector<1x16xi32>
      %64 = arith.cmpi slt, %49, %63 : vector<1x16xi32>
      %65 = arith.andi %61, %64 : vector<1x16xi1>
      %66 = vector.broadcast %47 : vector<16x1xi1> to vector<16x16xi1>
      %67 = vector.broadcast %65 : vector<1x16xi1> to vector<16x16xi1>
      %68 = arith.ori %66, %67 : vector<16x16xi1>
      %69 = vector.shape_cast %68 : vector<16x16xi1> to vector<1x1x16x16xi1>
      %c0_6 = arith.constant 0 : index
      %c0_7 = arith.constant 0 : index
      %c0_8 = arith.constant 0 : index
      %c0_9 = arith.constant 0 : index
      %70 = vector.load %arg3[%c0_6, %c0_7, %c0_8, %c0_9] : memref<1x4x16x16xf32, #tpu.memory_space<vmem>>, vector<1x4x16x16xf32>
      %cst = arith.constant 0.000000e+00 : f32
      %71 = vector.shape_cast %69 : vector<1x1x16x16xi1> to vector<1x1x16x16xi1>
      %72 = vector.broadcast %71 : vector<1x1x16x16xi1> to vector<1x4x16x16xi1>
      %73 = vector.broadcast %cst : f32 to vector<1x4x16x16xf32>
      %74 = arith.select %72, %70, %73 : vector<1x4x16x16xi1>, vector<1x4x16x16xf32>
      %c0_10 = arith.constant 0 : index
      %c0_11 = arith.constant 0 : index
      %c0_12 = arith.constant 0 : index
      %c0_13 = arith.constant 0 : index
      %75 = vector.load %arg4[%c0_10, %c0_11, %c0_12, %c0_13] : memref<1x4x16x16xf32, #tpu.memory_space<vmem>>, vector<1x4x16x16xf32>
      tpu.vector_store %arg4[%c0_10, %c0_11, %c0_12, %c0_13], %74 {strides = array<i32>} : memref<1x4x16x16xf32, #tpu.memory_space<vmem>>, vector<1x4x16x16xf32>,
    } else {
    }
    return
  }
  func.func @transform_0(%arg0: i32, %arg1: i32, %arg2: memref<7x2xi32, #tpu.memory_space<smem>>) -> (i32, i32, i32, i32) {
    %c0_i32 = arith.constant 0 : i32
    %c0_i32_0 = arith.constant 0 : i32
    %c0_i32_1 = arith.constant 0 : i32
    return %arg0, %c0_i32, %arg1, %c0_i32_0 : i32, i32, i32, i32
  }
  func.func @transform_1(%arg0: i32, %arg1: i32, %arg2: memref<7x2xi32, #tpu.memory_space<smem>>) -> (i32, i32, i32, i32) {
    %c0_i32 = arith.constant 0 : i32
    %c0_i32_0 = arith.constant 0 : i32
    %c0_i32_1 = arith.constant 0 : i32
    return %arg0, %c0_i32, %arg1, %c0_i32_0 : i32, i32, i32, i32
  }
}

</mosaic_0001>

<bundles_post_ra>
// kernel: tpu_custom_call.1
= control target key start
LH: loop header
LB: loop body
LE: loop exit
PB: predicated region body
PF: predicated region fallthrough
CT: control target
= control target key end

     0   :  { %s892_s0 = inlined_call_operand.vmem [shape: s32[7,2], index: 0, kind: input, shape index: {}]   ;;  %s893_s1 = inlined_call_operand.hbm [shape: f32[2,4,16,16], index: 1, kind: input, shape index: {}]   ;;  %s894_s2 = inlined_call_operand.hbm [shape: f32[2,4,16,16], index: 2, kind: output, shape index: {}]  }
   0x1   :  { %897 = sst [smem:[#allocation14_spill]] %s893_s1  ;;  %s7_s11 = sshll.u32 %s892_s0, 4  ;;  %s8_s11 = int_to_ptr.vmem [resolvable:$true] %s7_s11 }
   0x2   :  { %s517_s12 = scalar_lea.vmem %s8_s11, 128  ;;  %p522_p1 = scmp.lt.s32.totalorder %s8_s11, %s8_s11 }
   0x3   :  { %p518_p0 = scmp.ne.s32.totalorder %s8_s11, %s517_s12  ;;  %p523_p2 = scmp.lt.s32.totalorder %s517_s12, %s517_s12 }
   0x5   :  { %p524_p3 = por %p523_p2, %p522_p1 }
   0x7   :  { %p525_p4 = pnand %p524_p3, %p518_p0 }
   0x9   :  { %528 = shalt.err (!%p525_p4)  }
   0xa   :  { %s641_s13 = smov [#allocation3]  }
   0xb   :  { %10 = dma.vmem_to_smem %s8_s11, 128, %s641_s13, [#allocation2] }
   0xc   :  { %607 = dma.done.wait [#allocation2], 128 }
   0xd   :  { %608 = vsyncadd [#allocation2], 4294967168 }
   0xe   :  { %12 = sfence }
   0xf   :  { %13 = vsyncpa [#allocation5], 0 }
  0x10   :  { %15 = vsyncpa [#allocation5 + $0x1], 0 }
  0x11   :  { %16 = vsyncpa [#allocation6], 0 }
  0x12   :  { %18 = vsyncpa [#allocation6 + $0x1], 0  ;;  %s666_s14 = smov 0   ;;  %s668_s0 = smov 0  }
  0x13   :  { %s670_s15 = smov 0   ;;  %s672_s16 = smov 0  }
  0x14   :  { %s674_s17 = smov 0   ;;  %s676_s18 = smov 0  }
  0x15 LB: > { %898 = sst [smem:[#allocation11_spill]] %s635_s17  ;;  %s411_s19 = sadd.s32 4294967295, %s639_s18   ;;  %s639_s18 = sphi %s676_s18, %s24_s18   ;;  %s635_s17 = sphi %s674_s17, %s912_s17   ;;  %s631_s16 = sphi %s672_s16, %s911_s16   ;;  %s627_s15 = sphi %s670_s15, %s915_s15   ;;  %s623_s0 = sphi %s668_s0, %s914_s0   ;;  %s619_s14 = sphi %s666_s14, %s913_s14  }
  0x16   : > { %s412_s20 = sadd.s32 4294967294, %s639_s18   ;;  %s36_s21 = sadd.s32 1, %s635_s17 }
  0x17   : > { %s45_s22 = sadd.s32 1, %s627_s15  ;;  %p38_p5 = scmp.ge.s32.totalorder %s36_s21, 2 }
  0x18   : > { %p52_p6 = scmp.ne.s32.totalorder %s627_s15, %s623_s0  ;;  %p53_p7 = scmp.eq.s32.totalorder %s639_s18, 0 }
  0x19   : > { %p58_p8 = scmp.ne.s32.totalorder %s623_s0, %s619_s14  ;;  %s917_s21 = smov (%p38_p5, %s36_s21), 0 }
  0x1a   : > { %899 = sst [smem:[#allocation12_spill]] %s917_s21  ;;  %p707_p9 = por %p53_p7, %p52_p6 }
  0x1b   : > { %p59_p10 = scmp.eq.s32.totalorder %s411_s19, 0  ;;  %s40_s24 = ssub.s32 %s635_s17, %s917_s21 }
  0x1c   : > { %p84_p11 = scmp.eq.s32.totalorder %s411_s19, 1  ;;  %p43_p12 = scmp.eq.s32.totalorder %s40_s24, 0 }
  0x1d   : > { %p713_p13 = por %p59_p10, %p58_p8  ;;  %p90_p1 = scmp.eq.s32.totalorder %s412_s20, 1 }
  0x1e   : > { %p717_p0 = por %p84_p11, %p52_p6  ;;  %p460_p4 = scmp.lt.s32.totalorder %s639_s18, 2 }
  0x1f   : > { %s722_s27 = scalar_select %p43_p12, %s627_s15, %s45_s22  }
  0x20   : > { %p724_p2 = por %p90_p1, %p58_p8  ;;  %s110_s29 = sand.u32 1, %s627_s15  }
  0x21   : > { %903 = sst [smem:[#allocation13_spill]] %s722_s27  ;;  %s415_s30 = sshll.u32 %s110_s29, 6 }
  0x22   : > { %s434_s3 = sshll.u32 %s635_s17, 10  ;;  %s905_s1 = sld [smem:[#allocation14_spill]] }
  0x23   : > { %s114_s7 = scalar_lea.vmem [#allocation4], %s415_s30  ;;  %p737_p5 = pnand %p460_p4, %p707_p9 }
  0x24   : > { %s123_s8 = sshll.u32 %s114_s7, 4  ;;  %p418_p6 = scmp.ge.s32.totalorder %s639_s18, 1  ;;  %s124_s8 = int_to_ptr.vmem [resolvable:$true] %s123_s8 }
  0x25   : > { %s111_s10 = scalar_lea.sflag [#allocation5], %s110_s29  ;;  %p531_p7 = pneg %p737_p5 }
  0x26   : > { %s542_s11 = scalar_lea.vmem %s124_s8, 1024  ;;  %s642_s12 = smov [#allocation4]  }
  0x27   : > { %p543_p8 = scmp.ne.s32.totalorder %s124_s8, %s542_s11  ;;  %s547_s13 = sshll.u32 %s642_s12, 4  ;;  %s548_s13 = int_to_ptr.vmem [resolvable:$false] %s547_s13 }
  0x28   : > { %s122_s6 = scalar_lea.hbm %s905_s1, %s434_s3  ;;  %s549_s19 = scalar_lea.vmem %s548_s13, 2048 }
  0x29   : > { %p545_p10 = pnand %p543_p8, %p531_p7  ;;  %p550_p12 = scmp.lt.s32.totalorder %s124_s8, %s548_s13 }
  0x2a   : > { %p551_p1 = scmp.lt.s32.totalorder %s549_s19, %s542_s11 }
  0x2b   : > { %p546_p11 = pneg %p545_p10 }
  0x2c   : > { %p552_p3 = por %p551_p1, %p550_p12 }
  0x2e   : > { %p553_p9 = pnand %p552_p3, %p546_p11 }
  0x30   : > { %556 = shalt.err (!%p553_p9)
}
  0x31   : > { %s643_s20 = smov 128   ;;  %s644_s22 = smov 8  }
  0x32   : > { %455 = dma.hbm_to_vmem [thread:$0]  (!%p737_p5), %s122_s6, 1024, %s124_s8, %s111_s10, %s643_s20, %s643_s20, %s644_s22  }
  0x33   : > { %p131_p4 = scmp.lt.s32.totalorder %s639_s18, 3 }
  0x35   : > { %p132_p7 = pnand %p418_p6, %p131_p4 }
  0x36   : > { %s750_s23 = sand.u32 (!%p132_p7), 1, %s623_s0  }
  0x37   : > { %135 = sbr.rel (%p132_p7) target bundleno = 151 (0x97), region = 24  ;;  %s419_s24 = sshll.u32 (!%p132_p7), %s750_s23, 6 }
  0x38   : > { %s138_s29 = scalar_lea.sflag (!%p132_p7), [#allocation5], %s750_s23  ;;  %s754_s30 = scalar_lea.vmem (!%p132_p7), [#allocation4], %s419_s24 }
  0x3c   : > { %610 = dma.done.wait (%p713_p13), %s138_s29, 1024  }
  0x3d   : > { %612 = vsyncadd (%p713_p13), %s138_s29, 4294966272  ;;  %s163_s3 = sshra.s32 %s631_s16, 7  ;;  %s168_s4 = sand.u32 127, %s631_s16 }
  0x3e   : > { %s763_s5 = sld [smem:[#allocation3 + %s631_s16]]  ;;  %s435_s6 = sshll.u32 %s163_s3, 7 }
  0x3f   : > { %s436_s7 = sadd.s32 128, %s435_s6  ;;  %s438_s8 = sadd.s32 256, %s435_s6 }
  0x40   : > { %s169_s9 = sadd.s32 %s436_s7, %s168_s4  ;;  %s173_s10 = sadd.s32 %s438_s8, %s168_s4 }
  0x41   : > { %s765_s11 = sld [smem:[#allocation3 + %s169_s9]]  ;;  %s440_s12 = sadd.s32 384, %s435_s6 }
  0x42   : > { %s767_s13 = sld [smem:[#allocation3 + %s173_s10]]  ;;  %s177_s19 = sadd.s32 %s440_s12, %s168_s4 }
  0x43   : > { %s769_s25 = sld [smem:[#allocation3 + %s177_s19]]  ;;  %s442_s20 = sadd.s32 512, %s435_s6 }
  0x44   : > { %s181_s22 = sadd.s32 %s442_s20, %s168_s4  ;;  %s444_s29 = sadd.s32 640, %s435_s6 }
  0x45   : > { %s771_s1 = sld [smem:[#allocation3 + %s181_s22]]  ;;  %s185_s21 = sadd.s32 %s444_s29, %s168_s4 }
  0x46   : > { %s773_s17 = sld [smem:[#allocation3 + %s185_s21]]  ;;  %s446_s3 = sadd.s32 768, %s435_s6 }
  0x47   : > { %s189_s27 = sadd.s32 %s446_s3, %s168_s4  ;;  %s777_s8 = scalar_lea.vmem [#allocation7], %s419_s24 }
  0x48   : > { %s775_s7 = sld [smem:[#allocation3 + %s189_s27]]  ;;  %p427_p13 = scmp.ne.s32.totalorder %s763_s5, 0 }
  0x4a   : > { %194 = sbr.rel (%p427_p13) target bundleno = 84 (0x54), region = 32 }
  0x4f   : > { %v195_v0 = vld [vmem:[%s754_s30] sm:$0xff]  ;;  %vm203_vm0 = vcmask 130048   ;;  %v196_v1 = vld [vmem:[%s754_s30 + $0x8] sm:$0xff]  ;;  %v197_v2 = vld [vmem:[%s754_s30 + $0x10] sm:$0xff] }
  0x50   : > { %204 = vst.msk [vmem:[%s777_s8] sm:$0xff] %vm203_vm0, %v195_v0  ;;  %205 = vst.msk [vmem:[%s777_s8 + $0x8] sm:$0xff] %vm203_vm0, %v196_v1  ;;  %v198_v3 = vld [vmem:[%s754_s30 + $0x18] sm:$0xff]  ;;  %v199_v4 = vld [vmem:[%s754_s30 + $0x20] sm:$0xff] }
  0x51   : > { %206 = vst.msk [vmem:[%s777_s8 + $0x10] sm:$0xff] %vm203_vm0, %v197_v2  ;;  %v200_v5 = vld [vmem:[%s754_s30 + $0x28] sm:$0xff]  ;;  %207 = vst.msk [vmem:[%s777_s8 + $0x18] sm:$0xff] %vm203_vm0, %v198_v3  ;;  %v201_v6 = vld [vmem:[%s754_s30 + $0x30] sm:$0xff] }
  0x52   : > { %208 = vst.msk [vmem:[%s777_s8 + $0x20] sm:$0xff] %vm203_vm0, %v199_v4  ;;  %209 = vst.msk [vmem:[%s777_s8 + $0x28] sm:$0xff] %vm203_vm0, %v200_v5  ;;  %v202_v7 = vld [vmem:[%s754_s30 + $0x38] sm:$0xff] }
  0x53   : > { %210 = vst.msk [vmem:[%s777_s8 + $0x30] sm:$0xff] %vm203_vm0, %v201_v6  ;;  %211 = vst.msk [vmem:[%s777_s8 + $0x38] sm:$0xff] %vm203_vm0, %v202_v7 }
  0x54 PF: > { %p428_p3 = scmp.eq.s32.totalorder %s763_s5, 0 }
  0x55   : > { %s216_s21 = scvt.s32.f32 (!%p428_p3), %s765_s11  ;;  %s251_s27 = smul.u32 (!%p428_p3), %s773_s17, %s765_s11 }
  0x56   : > { %215 = sbr.rel (%p428_p3) target bundleno = 127 (0x7f), region = 36  ;;  %s217_s24 = scvt.s32.f32 (!%p428_p3), %s767_s13 }
  0x57   : > { %s267_s4 = smul.u32 (!%p428_p3), %s775_s7, %s765_s11 }
  0x5b   : > { %v218_v8 = vlaneseq  ;;  %v234_v11 = vstv %s216_s21  ;;  %v229_v15 = vstv %s769_s25  ;;  %v257_v16 = vstv %s771_s1  ;;  %v279_v40 = vld [vmem:[%s754_s30] sm:$0xff] }
  0x5c   : > { %515 = vrcp.f32 %v234_v11  ;;  %v252_v32 = vstv %s251_s27  ;;  %v246_v35 = vstv %s217_s24  ;;  %v268_v38 = vstv %s267_s4  ;;  %v281_v41 = vld [vmem:[%s754_s30 + $0x10] sm:$0xff] }
  0x5d   : > { %v219_v9 = vshrl.u32 %v218_v8, 7  ;;  %v227_v10 = vand.u32 127, %v218_v8  ;;  %v283_v42 = vld [vmem:[%s754_s30 + $0x20] sm:$0xff]  ;;  %v285_v43 = vld [vmem:[%s754_s30 + $0x30] sm:$0xff]  ;;  %vm299_vm13 = vcmask 130048   ;;  %v280_v45 = vld [vmem:[%s754_s30 + $0x8] sm:$0xff] }
  0x5e   : > { %v282_v46 = vld [vmem:[%s754_s30 + $0x18] sm:$0xff]  ;;  %v284_v50 = vld [vmem:[%s754_s30 + $0x28] sm:$0xff] }
  0x5f   : > { %v220_v12 = vadd.s32 8, %v219_v9  ;;  %v224_v13 = vadd.s32 4, %v219_v9  ;;  %v228_v14 = vadd.s32 4, %v227_v10  ;;  %v286_v52 = vld [vmem:[%s754_s30 + $0x38] sm:$0xff] }
  0x61   : > { %v225_v17 = vadd.s32 4, %v220_v12  ;;  %v230_v18 = vsub.s32 %v224_v13, %v229_v15  ;;  %v258_v19 = vsub.s32 %v228_v14, %v257_v16 }
  0x63   : > { %v231_v20 = vsub.s32 %v225_v17, %v229_v15  ;;  %v232_v21 = vcvt.s32.f32 %v230_v18  ;;  %v259_v22 = vcvt.s32.f32 %v258_v19  ;;  %vm244_vm1 = vcmp.ge.s32.totalorder %v230_v18, 0 }
  0x64   : > { %vm253_vm2 = vcmp.lt.s32.totalorder %v230_v18, %v252_v32  ;;  %vm264_vm4 = vcmp.ge.s32.totalorder %v258_v19, 0  ;;  %vm269_vm7 = vcmp.lt.s32.totalorder %v258_v19, %v268_v38 }
  0x65   : > { %v233_v23 = vcvt.s32.f32 %v231_v20  ;;  %vm245_vm10 = vcmp.ge.s32.totalorder %v231_v20, 0  ;;  %vm254_vm14 = vcmp.lt.s32.totalorder %v231_v20, %v252_v32 }
  0x69   : > { %v516_v24 = vpop.eup %515 }
  0x6a   : > { %v236_v25 = vmul.f32 %v516_v24, %v232_v21  ;;  %v260_v26 = vmul.f32 %v516_v24, %v259_v22  ;;  %v237_v27 = vmul.f32 %v516_v24, %v233_v23 }
  0x6c   : > { %v238_v28 = vfloor.f32 %v236_v25  ;;  %v261_v29 = vfloor.f32 %v260_v26  ;;  %v239_v30 = vfloor.f32 %v237_v27 }
  0x6e   : > { %v240_v31 = vmul.f32 %v238_v28, %v234_v11  ;;  %v262_v33 = vmul.f32 %v261_v29, %v234_v11  ;;  %v241_v34 = vmul.f32 %v239_v30, %v234_v11 }
  0x70   : > { %v242_v36 = vsub.f32 %v232_v21, %v240_v31  ;;  %v263_v37 = vsub.f32 %v259_v22, %v262_v33  ;;  %v243_v39 = vsub.f32 %v233_v23, %v241_v34 }
  0x72   : > { %vm247_vm3 = vcmp.lt.f32.partialorder %v242_v36, %v246_v35  ;;  %vm265_vm5 = vcmp.lt.f32.partialorder %v263_v37, %v246_v35  ;;  %vm248_vm11 = vcmp.lt.f32.partialorder %v243_v39, %v246_v35 }
  0x73   : > { %vm249_vm6 = vmand %vm244_vm1, %vm247_vm3 }
  0x74   : > { %vm255_vm8 = vmand %vm249_vm6, %vm253_vm2 }
  0x75   : > { %vm266_vm9 = vmand %vm264_vm4, %vm265_vm5 }
  0x76   : > { %vm809_vm12 = vmand %vm266_vm9, %vm269_vm7 }
  0x77   : > { %vm277_vm15 = vmor %vm255_vm8, %vm809_vm12 }
  0x78   : > { %v291_v47 = vsel %vm277_vm15, %v279_v40, 0.0  ;;  %vm250_vm0 = vmand %vm245_vm10, %vm248_vm11  ;;  %v293_v48 = vsel %vm277_vm15, %v281_v41, 0.0  ;;  %v295_v49 = vsel %vm277_vm15, %v283_v42, 0.0  ;;  %v297_v51 = vsel %vm277_vm15, %v285_v43, 0.0 }
  0x79   : > { %300 = vst.msk [vmem:[%s777_s8] sm:$0xff] %vm299_vm13, %v291_v47  ;;  %vm256_vm1 = vmand %vm250_vm0, %vm254_vm14 }
  0x7a   : > { %302 = vst.msk [vmem:[%s777_s8 + $0x10] sm:$0xff] %vm299_vm13, %v293_v48  ;;  %304 = vst.msk [vmem:[%s777_s8 + $0x20] sm:$0xff] %vm299_vm13, %v295_v49 }
  0x7b   : > { %306 = vst.msk [vmem:[%s777_s8 + $0x30] sm:$0xff] %vm299_vm13, %v297_v51  ;;  %vm278_vm2 = vmor %vm256_vm1, %vm809_vm12 }
  0x7c   : > { %v292_v53 = vsel %vm278_vm2, %v280_v45, 0.0  ;;  %v294_v54 = vsel %vm278_vm2, %v282_v46, 0.0  ;;  %v296_v55 = vsel %vm278_vm2, %v284_v50, 0.0  ;;  %v298_v56 = vsel %vm278_vm2, %v286_v52, 0.0 }
  0x7d   : > { %301 = vst.msk [vmem:[%s777_s8 + $0x8] sm:$0xff] %vm299_vm13, %v292_v53  ;;  %303 = vst.msk [vmem:[%s777_s8 + $0x18] sm:$0xff] %vm299_vm13, %v294_v54 }
  0x7e   : > { %305 = vst.msk [vmem:[%s777_s8 + $0x28] sm:$0xff] %vm299_vm13, %v296_v55  ;;  %307 = vst.msk [vmem:[%s777_s8 + $0x38] sm:$0xff] %vm299_vm13, %v298_v56 }
  0x7f PF: > { %s447_s1 = sshll.u32 %s631_s16, 10  ;;  %s324_s6 = sshll.u32 %s777_s8, 4  ;;  %s844_s6 = int_to_ptr.vmem [resolvable:$true] %s324_s6 }
  0x80   : > { %s841_s5 = scalar_lea.hbm %s894_s2, %s447_s1  ;;  %s309_s9 = scalar_lea.sflag [#allocation6], %s750_s23 }
  0x81   : > { %s557_s10 = scalar_lea.vmem %s844_s6, 1024  ;;  %s645_s11 = smov [#allocation7]  }
  0x82   : > { %p558_p5 = scmp.ne.s32.totalorder %s844_s6, %s557_s10  ;;  %s561_s12 = sshll.u32 %s645_s11, 4  ;;  %s562_s12 = int_to_ptr.vmem [resolvable:$false] %s561_s12 }
  0x83   : > { %s563_s16 = scalar_lea.vmem %s562_s12, 2048  ;;  %p564_p10 = scmp.lt.s32.totalorder %s844_s6, %s562_s12 }
  0x84   : > { %p559_p6 = pnand %p558_p5, %p717_p0  ;;  %p565_p11 = scmp.lt.s32.totalorder %s563_s16, %s557_s10 }
  0x86   : > { %p560_p8 = pneg %p559_p6  ;;  %p566_p12 = por %p565_p11, %p564_p10 }
  0x88   : > { %p567_p1 = pnand %p566_p12, %p560_p8 }
  0x8a   : > { %570 = shalt.err (!%p567_p1)
}
  0x8b   : > { %s571_s13 = scalar_lea.hbm %s841_s5, 1024  ;;  %s575_s20 = scalar_lea.hbm %s894_s2, 2048 }
  0x8c   : > { %p572_p9 = scmp.ne.s32.totalorder %s841_s5, %s571_s13  ;;  %p576_p13 = scmp.lt.s32.totalorder %s841_s5, %s894_s2 }
  0x8d   : > { %p577_p3 = scmp.lt.s32.totalorder %s575_s20, %s571_s13 }
  0x8e   : > { %p573_p4 = pnand %p572_p9, %p717_p0 }
  0x8f   : > { %p578_p5 = por %p577_p3, %p576_p13 }
  0x90   : > { %p574_p7 = pneg %p573_p4 }
  0x92   : > { %p579_p6 = pnand %p578_p5, %p574_p7 }
  0x94   : > { %582 = shalt.err (!%p579_p6)
}
  0x95   : > { %s646_s3 = smov 128   ;;  %s647_s7 = smov 8  }
  0x96   : > { %450 = dma.vmem_to_hbm [thread:$0]  (%p717_p0), %s844_s6, 1024, %s841_s5, %s309_s9, %s646_s3, %s646_s3, %s647_s7  }
  0x97 PF: > { %s339_s8 = sand.u32 1, %s619_s14   ;;  %p909_p8 = scmp.ge.s32.totalorder %s639_s18, 2 }
  0x98   : > { %s340_s21 = scalar_lea.sflag [#allocation6], %s339_s8 }
  0x99   : > { %p457_p10 = pnand %p909_p8, %p724_p2 }
  0x9b   : > { %p458_p11 = pneg %p457_p10 }
  0x9d   : > { %614 = dma.done.wait (%p458_p11), %s340_s21, 1024  }
  0x9e   : > { %616 = vsyncadd (%p458_p11), %s340_s21, 4294966272  ;;  %s24_s18 = sadd.s32 1, %s639_s18   ;;  %s910_s26 = sld [smem:[#allocation13_spill]] }
  0x9f   : > { %p21_p12 = scmp.ge.s32.totalorder %s24_s18, 4   ;;  %s911_s16 = sld [smem:[#allocation11_spill]] }
  0xa0   : > { %s912_s17 = sld [smem:[#allocation12_spill]]  ;;  %s913_s14 = smov %s623_s0 }
  0xa1   : > { %s914_s0 = smov %s627_s15  ;;  %23 = sbr.rel (!%p21_p12) target bundleno = 21 (0x15), region = 77 }
  0xa4   : > { %s915_s15 = smov %s910_s26 }
  0xa6   :  { %345 = vsyncpa [#allocation5], 1 }
  0xa7   :  { %347 = vsyncpa [#allocation5 + $0x1], 1 }
  0xa8   :  { %348 = vsyncpa [#allocation6], 1 }
  0xa9   :  { %350 = vsyncpa [#allocation6 + $0x1], 1 }

</bundles_post_ra>
